<compile_context>
chip_gen: v5e
topology: v5e:2x2
jax: 0.10.0
libtpu: 0.0.40
codegen_flags: <defaults>
</compile_context>

<pallas_src>
import functools

import jax
import jax.numpy as jnp
from jax.experimental import pallas as pl
from jax.experimental.pallas import tpu as pltpu

LANE = 128      # vreg lane width
SUBLANE = 8     # vreg sublane count (f32)


def _round_up(n: int, m: int) -> int:
    return ((n + m - 1) // m) * m


# ---------------------------------------------------------------------------
# Kernel: one batch tile per grid step; weights/biases stay VMEM-resident.
# Layout: activations (batch, features); weights (in_features, out_features)
# so y = x @ W + b (PyTorch nn.Linear with W^T).
# ---------------------------------------------------------------------------
def actor_kernel(x_ref, w1_ref, b1_ref, w2_ref, b2_ref, w3_ref, b3_ref, out_ref):
    n_act = out_ref.shape[1]

    # fc1 + ReLU (cast of x is in-kernel; no-op for f32 inputs)
    x = x_ref[...].astype(jnp.float32)
    h1 = jnp.dot(x, w1_ref[...], preferred_element_type=jnp.float32)
    h1 = jnp.maximum(h1 + b1_ref[...], 0.0)

    # fc2 + ReLU
    h2 = jnp.dot(h1, w2_ref[...], preferred_element_type=jnp.float32)
    h2 = jnp.maximum(h2 + b2_ref[...], 0.0)

    # mu + tanh: lane-dense (tb, 128) matmul, then slice to the real n_actions
    # columns before the narrow (masked) store.
    mu = jnp.dot(h2, w3_ref[...], preferred_element_type=jnp.float32)
    out_ref[...] = jnp.tanh(mu[:, :n_act] + b3_ref[:, :n_act]).astype(out_ref.dtype)


# ---------------------------------------------------------------------------
# One-time parameter packing: pad hidden/output feature dims to the 128-lane
# width (zero rows/cols keep the math exact). Input dim is left unpadded so the
# activation DMA stays at its natural width. Everything stays f32 for fidelity
# with the PyTorch module; weights are tiny and VMEM-resident anyway.
# ---------------------------------------------------------------------------
def prepare_params(w1, b1, w2, b2, w3, b3):
    d_in, d1 = w1.shape
    _, d2 = w2.shape
    _, d3 = w3.shape
    p1, p2, p3 = (_round_up(d, LANE) for d in (d1, d2, d3))

    w1p = jnp.pad(w1, ((0, 0), (0, p1 - d1))).astype(jnp.float32)
    b1p = jnp.pad(b1, ((0, 0), (0, p1 - d1))).astype(jnp.float32)
    w2p = jnp.pad(w2, ((0, p1 - d1), (0, p2 - d2))).astype(jnp.float32)
    b2p = jnp.pad(b2, ((0, 0), (0, p2 - d2))).astype(jnp.float32)
    w3p = jnp.pad(w3, ((0, p2 - d2), (0, p3 - d3))).astype(jnp.float32)
    b3p = jnp.pad(b3, ((0, 0), (0, p3 - d3))).astype(jnp.float32)
    return w1p, b1p, w2p, b2p, w3p, b3p


# ---------------------------------------------------------------------------
# Forward wrapper: no input copies, ragged batch grid, narrow output.
# ---------------------------------------------------------------------------
@functools.partial(jax.jit, static_argnames=("n_actions", "tile_b"))
def actor_forward(x, w1, b1, w2, b2, w3, b3, *, n_actions, tile_b=512):
    batch, in_dims = x.shape
    assert in_dims == w1.shape[0], "input feature dim must match fc1 fan-in"

    # Batch tile: big enough to amortize the ~0.35 us/step grid overhead, but capped at
    # ~half the batch (sublane-rounded) so v7x's 2 TensorCores both get work.
    half = _round_up(max(-(-batch // 2), SUBLANE), SUBLANE)
    tb = max(SUBLANE, min(tile_b, half))
    grid = (pl.cdiv(batch, tb),)   # ragged last block: stores are masked to bounds

    out = pl.pallas_call(
        actor_kernel,
        out_shape=jax.ShapeDtypeStruct((batch, n_actions), jnp.float32),
        grid_spec=pltpu.PrefetchScalarGridSpec(
            num_scalar_prefetch=0,
            grid=grid,
            in_specs=[
                # activations stream over the batch axis, unpadded feature width
                pl.BlockSpec((tb, in_dims), lambda i: (i, 0)),
                # weights / biases: constant index_map -> VMEM-resident across all steps
                pl.BlockSpec(w1.shape, lambda i: (0, 0)),
                pl.BlockSpec(b1.shape, lambda i: (0, 0)),
                pl.BlockSpec(w2.shape, lambda i: (0, 0)),
                pl.BlockSpec(b2.shape, lambda i: (0, 0)),
                pl.BlockSpec(w3.shape, lambda i: (0, 0)),
                pl.BlockSpec(b3.shape, lambda i: (0, 0)),
            ],
            # narrow output: last dim == full array dim (n_actions), cheap masked vst
            out_specs=pl.BlockSpec((tb, n_actions), lambda i: (i, 0)),
        ),
        compiler_params=pltpu.CompilerParams(
            # batch tiles are independent -> shard across the 2 TCs on v7x
            dimension_semantics=("parallel",),
        ),
    )(x, w1, b1, w2, b2, w3, b3)

    return out


# ---------------------------------------------------------------------------
# Pure-JAX f32 reference (mirrors the PyTorch ActorNetwork forward).
# ---------------------------------------------------------------------------
def actor_reference(x, w1, b1, w2, b2, w3, b3):
    h = jnp.maximum(jnp.dot(x, w1) + b1, 0.0)
    h = jnp.maximum(jnp.dot(h, w2) + b2, 0.0)
    return jnp.tanh(jnp.dot(h, w3) + b3)


# ---------------------------------------------------------------------------
# Deterministic synthetic init mimicking PyTorch Linear default:
# U(-1/sqrt(fan_in), 1/sqrt(fan_in)) for both weight and bias.
# ---------------------------------------------------------------------------
def init_params(key, input_dims, fc1_dims, fc2_dims, n_actions):
    ks = jax.random.split(key, 6)

    def lin(kw, kb, fan_in, fan_out):
        bound = 1.0 / jnp.sqrt(fan_in)
        w = jax.random.uniform(kw, (fan_in, fan_out), jnp.float32, -bound, bound)
        b = jax.random.uniform(kb, (1, fan_out), jnp.float32, -bound, bound)
        return w, b

    w1, b1 = lin(ks[0], ks[1], input_dims, fc1_dims)
    w2, b2 = lin(ks[2], ks[3], fc1_dims, fc2_dims)
    w3, b3 = lin(ks[4], ks[5], fc2_dims, n_actions)
    return w1, b1, w2, b2, w3, b3


if __name__ == "__main__":
    key = jax.random.PRNGKey(0)
    k_in1, k_in2, k_params = jax.random.split(key, 3)

    input_dims, fc1_dims, fc2_dims, n_actions = 16, 32, 32, 4
    raw = init_params(k_params, input_dims, fc1_dims, fc2_dims, n_actions)
    packed = prepare_params(*raw)

    # Both kernel and reference use TPU default matmul precision; keep a tolerance
    # that absorbs the small difference in bf16-pass rounding between the two paths.
    TOL = 2e-2

    # Small batch (single grid step, partial batch block).
    x_small = jax.random.normal(k_in1, (8, input_dims), jnp.float32)
    out_small = jax.block_until_ready(
        actor_forward(x_small, *packed, n_actions=n_actions)
    )
    ref_small = actor_reference(x_small, *raw)
    assert out_small.shape == (8, n_actions)
    assert jnp.allclose(out_small, ref_small, atol=TOL, rtol=TOL)

    # Larger, non-multiple batch exercises the multi-step grid + ragged last block.
    x_big = jax.random.normal(k_in2, (500, input_dims), jnp.float32)
    out_big = jax.block_until_ready(
        actor_forward(x_big, *packed, n_actions=n_actions)
    )
    ref_big = actor_reference(x_big, *raw)
    assert out_big.shape == (500, n_actions)
    assert jnp.allclose(out_big, ref_big, atol=TOL, rtol=TOL)

    print("KERNEL_OK")
</pallas_src>

<mosaic_0001>
module attributes {stable_mosaic.version = 11 : i64} {
  func.func @actor_kernel(%arg0: i32, %arg1: memref<8x16xf32, #tpu.memory_space<vmem>>, %arg2: memref<16x128xf32, #tpu.memory_space<vmem>>, %arg3: memref<1x128xf32, #tpu.memory_space<vmem>>, %arg4: memref<128x128xf32, #tpu.memory_space<vmem>>, %arg5: memref<1x128xf32, #tpu.memory_space<vmem>>, %arg6: memref<128x128xf32, #tpu.memory_space<vmem>>, %arg7: memref<1x128xf32, #tpu.memory_space<vmem>>, %arg8: memref<8x4xf32, #tpu.memory_space<vmem>>) attributes {dimension_semantics = [#tpu.dimension_semantics<parallel>], iteration_bounds = array<i64: 1>, scalar_prefetch = 0 : i64, scratch_operands = 0 : i64, tpu.core_type = #tpu.core_type<tc>, window_params = [{transform_indices = @transform_0, window_bounds = array<i64: 8, 16>}, {pipeline_mode = #tpu.pipeline_mode<synchronous>, transform_indices = @transform_1, window_bounds = array<i64: 16, 128>}, {pipeline_mode = #tpu.pipeline_mode<synchronous>, transform_indices = @transform_2, window_bounds = array<i64: 1, 128>}, {pipeline_mode = #tpu.pipeline_mode<synchronous>, transform_indices = @transform_3, window_bounds = array<i64: 128, 128>}, {pipeline_mode = #tpu.pipeline_mode<synchronous>, transform_indices = @transform_4, window_bounds = array<i64: 1, 128>}, {pipeline_mode = #tpu.pipeline_mode<synchronous>, transform_indices = @transform_5, window_bounds = array<i64: 128, 128>}, {pipeline_mode = #tpu.pipeline_mode<synchronous>, transform_indices = @transform_6, window_bounds = array<i64: 1, 128>}, {transform_indices = @transform_7, window_bounds = array<i64: 8, 4>}]} {
    %c0 = arith.constant 0 : index
    %c0_0 = arith.constant 0 : index
    %0 = vector.load %arg1[%c0, %c0_0] : memref<8x16xf32, #tpu.memory_space<vmem>>, vector<8x16xf32>
    %c0_1 = arith.constant 0 : index
    %c0_2 = arith.constant 0 : index
    %1 = vector.load %arg2[%c0_1, %c0_2] : memref<16x128xf32, #tpu.memory_space<vmem>>, vector<16x128xf32>
    %cst = arith.constant dense<0.000000e+00> : vector<8x128xf32>
    %2 = tpu.matmul %0, %1, %cst {dimension_numbers = #tpu.dot_dimension_numbers<[1], [0], [0], [1], [0, 0, 1, 1], [], []>} : vector<8x16xf32>, vector<16x128xf32>, vector<8x128xf32> -> vector<8x128xf32>
    %c0_3 = arith.constant 0 : index
    %c0_4 = arith.constant 0 : index
    %3 = vector.load %arg3[%c0_3, %c0_4] : memref<1x128xf32, #tpu.memory_space<vmem>>, vector<1x128xf32>
    %4 = vector.broadcast %3 : vector<1x128xf32> to vector<8x128xf32>
    %5 = arith.addf %2, %4 : vector<8x128xf32>
    %cst_5 = arith.constant 0.000000e+00 : f32
    %6 = vector.broadcast %cst_5 : f32 to vector<8x128xf32>
    %7 = arith.maximumf %5, %6 : vector<8x128xf32>
    %c0_6 = arith.constant 0 : index
    %c0_7 = arith.constant 0 : index
    %8 = vector.load %arg4[%c0_6, %c0_7] : memref<128x128xf32, #tpu.memory_space<vmem>>, vector<128x128xf32>
    %cst_8 = arith.constant dense<0.000000e+00> : vector<8x128xf32>
    %9 = tpu.matmul %7, %8, %cst_8 {dimension_numbers = #tpu.dot_dimension_numbers<[1], [0], [0], [1], [0, 0, 1, 1], [], []>} : vector<8x128xf32>, vector<128x128xf32>, vector<8x128xf32> -> vector<8x128xf32>
    %c0_9 = arith.constant 0 : index
    %c0_10 = arith.constant 0 : index
    %10 = vector.load %arg5[%c0_9, %c0_10] : memref<1x128xf32, #tpu.memory_space<vmem>>, vector<1x128xf32>
    %11 = vector.broadcast %10 : vector<1x128xf32> to vector<8x128xf32>
    %12 = arith.addf %9, %11 : vector<8x128xf32>
    %cst_11 = arith.constant 0.000000e+00 : f32
    %13 = vector.broadcast %cst_11 : f32 to vector<8x128xf32>
    %14 = arith.maximumf %12, %13 : vector<8x128xf32>
    %c0_12 = arith.constant 0 : index
    %c0_13 = arith.constant 0 : index
    %15 = vector.load %arg6[%c0_12, %c0_13] : memref<128x128xf32, #tpu.memory_space<vmem>>, vector<128x128xf32>
    %cst_14 = arith.constant dense<0.000000e+00> : vector<8x128xf32>
    %16 = tpu.matmul %14, %15, %cst_14 {dimension_numbers = #tpu.dot_dimension_numbers<[1], [0], [0], [1], [0, 0, 1, 1], [], []>} : vector<8x128xf32>, vector<128x128xf32>, vector<8x128xf32> -> vector<8x128xf32>
    %17 = vector.extract_strided_slice %16 {offsets = [0, 0], sizes = [8, 4], strides = [1, 1]} : vector<8x128xf32> to vector<8x4xf32>
    %c0_15 = arith.constant 0 : index
    %c0_16 = arith.constant 0 : index
    %18 = vector.load %arg7[%c0_15, %c0_16] : memref<1x128xf32, #tpu.memory_space<vmem>>, vector<1x4xf32>
    %19 = vector.broadcast %18 : vector<1x4xf32> to vector<8x4xf32>
    %20 = arith.addf %17, %19 : vector<8x4xf32>
    %21 = math.tanh %20 : vector<8x4xf32>
    %c0_17 = arith.constant 0 : index
    %c0_18 = arith.constant 0 : index
    %22 = vector.load %arg8[%c0_17, %c0_18] : memref<8x4xf32, #tpu.memory_space<vmem>>, vector<8x4xf32>
    tpu.vector_store %arg8[%c0_17, %c0_18], %21 {strides = array<i32>} : memref<8x4xf32, #tpu.memory_space<vmem>>, vector<8x4xf32>,
    return
  }
  func.func @transform_0(%arg0: i32) -> (i32, i32) {
    %c0_i32 = arith.constant 0 : i32
    %c0_i32_0 = arith.constant 0 : i32
    return %arg0, %c0_i32 : i32, i32
  }
  func.func @transform_1(%arg0: i32) -> (i32, i32) {
    %c0_i32 = arith.constant 0 : i32
    %c0_i32_0 = arith.constant 0 : i32
    %c0_i32_1 = arith.constant 0 : i32
    return %c0_i32, %c0_i32_0 : i32, i32
  }
  func.func @transform_2(%arg0: i32) -> (i32, i32) {
    %c0_i32 = arith.constant 0 : i32
    %c0_i32_0 = arith.constant 0 : i32
    %c0_i32_1 = arith.constant 0 : i32
    return %c0_i32, %c0_i32_0 : i32, i32
  }
  func.func @transform_3(%arg0: i32) -> (i32, i32) {
    %c0_i32 = arith.constant 0 : i32
    %c0_i32_0 = arith.constant 0 : i32
    %c0_i32_1 = arith.constant 0 : i32
    return %c0_i32, %c0_i32_0 : i32, i32
  }
  func.func @transform_4(%arg0: i32) -> (i32, i32) {
    %c0_i32 = arith.constant 0 : i32
    %c0_i32_0 = arith.constant 0 : i32
    %c0_i32_1 = arith.constant 0 : i32
    return %c0_i32, %c0_i32_0 : i32, i32
  }
  func.func @transform_5(%arg0: i32) -> (i32, i32) {
    %c0_i32 = arith.constant 0 : i32
    %c0_i32_0 = arith.constant 0 : i32
    %c0_i32_1 = arith.constant 0 : i32
    return %c0_i32, %c0_i32_0 : i32, i32
  }
  func.func @transform_6(%arg0: i32) -> (i32, i32) {
    %c0_i32 = arith.constant 0 : i32
    %c0_i32_0 = arith.constant 0 : i32
    %c0_i32_1 = arith.constant 0 : i32
    return %c0_i32, %c0_i32_0 : i32, i32
  }
  func.func @transform_7(%arg0: i32) -> (i32, i32) {
    %c0_i32 = arith.constant 0 : i32
    %c0_i32_0 = arith.constant 0 : i32
    return %arg0, %c0_i32 : i32, i32
  }
}

</mosaic_0001>

<bundles_post_ra>
// kernel: actor_forward.1
= control target key start
LH: loop header
LB: loop body
LE: loop exit
PB: predicated region body
PF: predicated region fallthrough
CT: control target
= control target key end

     0   :  { %12 = vsyncpa [#allocation3], 0  ;;  %s395_s0 = inlined_call_operand.hbm [shape: f32[8,16], index: 0, kind: input, shape index: {}]   ;;  %s396_s1 = inlined_call_operand.hbm [shape: f32[16,128], index: 1, kind: input, shape index: {}]   ;;  %s397_s2 = inlined_call_operand.vmem [shape: f32[1,128], index: 2, kind: input, shape index: {}]   ;;  %s398_s3 = inlined_call_operand.hbm [shape: f32[128,128], index: 3, kind: input, shape index: {}]   ;;  %s399_s4 = inlined_call_operand.vmem [shape: f32[1,128], index: 4, kind: input, shape index: {}]   ;;  %s400_s5 = inlined_call_operand.hbm [shape: f32[128,128], index: 5, kind: input, shape index: {}]   ;;  %s401_s6 = inlined_call_operand.vmem [shape: f32[1,128], index: 6, kind: input, shape index: {}]   ;;  %s402_s7 = inlined_call_operand.vmem [shape: f32[8,4], index: 7, kind: output, shape index: {}]  }
   0x1   :  { %13 = vsyncpa [#allocation5], 0  ;;  %s30_s26 = sshll.u32 %s396_s1, 4  ;;  %s31_s26 = int_to_ptr.hbm [resolvable:$true] %s30_s26 }
   0x2   :  { %14 = vsyncpa [#allocation8], 0  ;;  %s325_s27 = smov [#allocation4]   ;;  %s20_s8 = sshll.u32 %s395_s0, 4  ;;  %s21_s8 = int_to_ptr.hbm [resolvable:$true] %s20_s8 }
   0x3   :  { %s32_s28 = sshll.u32 %s325_s27, 4  ;;  %s326_s9 = smov 128   ;;  %s33_s28 = int_to_ptr.vmem [resolvable:$true] %s32_s28 }
   0x4   :  { %s327_s10 = smov 8   ;;  %s328_s11 = smov [#allocation2]  }
   0x5   :  { %38 = dma.hbm_to_vmem [thread:$0]  %s31_s26, 256, %s33_s28, [#allocation5], %s326_s9, %s326_s9, %s327_s10  }
   0x6   :  { %s22_s12 = sshll.u32 %s328_s11, 4  ;;  %s45_s15 = sshll.u32 %s398_s3, 4  ;;  %s23_s12 = int_to_ptr.vmem [resolvable:$true] %s22_s12  ;;  %s46_s15 = int_to_ptr.hbm [resolvable:$true] %s45_s15 }
   0x7   :  { %25 = dma.hbm_to_vmem [thread:$0]  %s21_s8, 128, %s23_s12, [#allocation3]  }
   0x8   :  { %s60_s17 = sshll.u32 %s400_s5, 4  ;;  %s329_s18 = smov [#allocation6]   ;;  %s61_s17 = int_to_ptr.hbm [resolvable:$true] %s60_s17 }
   0x9   :  { %s47_s19 = sshll.u32 %s329_s18, 4  ;;  %s330_s0 = smov [#allocation7]   ;;  %s48_s19 = int_to_ptr.vmem [resolvable:$true] %s47_s19 }
   0xa   :  { %53 = dma.hbm_to_vmem [thread:$0]  %s46_s15, 2048, %s48_s19, [#allocation5], %s326_s9, %s326_s9, %s327_s10  }
   0xb   :  { %s62_s20 = sshll.u32 %s330_s0, 4  ;;  %s63_s20 = int_to_ptr.vmem [resolvable:$true] %s62_s20 }
   0xc   :  { %68 = dma.hbm_to_vmem [thread:$0]  %s61_s17, 2048, %s63_s20, [#allocation8], %s326_s9, %s326_s9, %s327_s10  }
   0xd   :  { %319 = dma.done.wait [#allocation3], 128  }
   0xe   :  { %320 = vsyncadd [#allocation3], 4294967168 }
   0xf   :  { %321 = dma.done.wait [#allocation5], 2304  }
  0x10   :  { %322 = vsyncadd [#allocation5], 4294964992 }
  0x11   :  { %323 = dma.done.wait [#allocation8], 2048  }
  0x12   :  { %324 = vsyncadd [#allocation8], 4294965248  ;;  %v89_v0 = vld [vmem:[#allocation4 + $0x8] sm:$0xff]  ;;  %v88_v1 = vld [vmem:[#allocation4] sm:$0xff]  ;;  %vm94_vm0 = vcmask 130048   ;;  %vm202_vm1 = vcmask 31744  }
  0x13   :  { %112 = vmatpush.msra.mxu0 %v89_v0  ;;  %v87_v2 = vld [vmem:[#allocation2] sm:$0xff]  ;;  %v134_v3 = vld [vmem:[#allocation6 + $0x78] sm:$0xff]  ;;  %v133_v4 = vld [vmem:[#allocation6 + $0x70] sm:$0xff] }
  0x14   :  { %139 = vmatpush.msra.mxu1 %v134_v3  ;;  %v132_v5 = vld [vmem:[#allocation6 + $0x68] sm:$0xff]  ;;  %v131_v6 = vld [vmem:[#allocation6 + $0x60] sm:$0xff]  ;;  %v130_v7 = vld [vmem:[#allocation6 + $0x58] sm:$0xff] }
  0x15   :  { %113 = vmatpush.msra.mxu0 %v88_v1  ;;  %v129_v8 = vld [vmem:[#allocation6 + $0x50] sm:$0xff]  ;;  %v128_v9 = vld [vmem:[#allocation6 + $0x48] sm:$0xff]  ;;  %v127_v10 = vld [vmem:[#allocation6 + $0x40] sm:$0xff] }
  0x16   :  { %211 = vmatmul.msk.f32.vlgmr.msra.gmra.mxu0 %vm94_vm0, %v87_v2  ;;  %140 = vmatpush.msra.mxu1 %v133_v4  ;;  %v126_v11 = vld [vmem:[#allocation6 + $0x38] sm:$0xff]  ;;  %v125_v12 = vld [vmem:[#allocation6 + $0x30] sm:$0xff]  ;;  %v124_v13 = vld [vmem:[#allocation6 + $0x28] sm:$0xff] }
  0x17   :  { %v123_v14 = vld [vmem:[#allocation6 + $0x20] sm:$0xff]  ;;  %v122_v15 = vld [vmem:[#allocation6 + $0x18] sm:$0xff]  ;;  %v121_v16 = vld [vmem:[#allocation6 + $0x10] sm:$0xff] }
  0x18   :  { %141 = vmatpush.msra.mxu1 %v132_v5  ;;  %v120_v17 = vld [vmem:[#allocation6 + $0x8] sm:$0xff]  ;;  %v119_v18 = vld [vmem:[#allocation6] sm:$0xff]  ;;  %v175_v19 = vld [vmem:[#allocation7 + $0x78] sm:$0xff] }
  0x19   :  { %v174_v20 = vld [vmem:[#allocation7 + $0x70] sm:$0xff]  ;;  %176 = vmatpush.msra.mxu2 %v175_v19  ;;  %v173_v21 = vld [vmem:[#allocation7 + $0x68] sm:$0xff]  ;;  %v172_v22 = vld [vmem:[#allocation7 + $0x60] sm:$0xff] }
  0x1a   :  { %142 = vmatpush.msra.mxu1 %v131_v6  ;;  %v171_v23 = vld [vmem:[#allocation7 + $0x58] sm:$0xff]  ;;  %v170_v24 = vld [vmem:[#allocation7 + $0x50] sm:$0xff]  ;;  %v169_v25 = vld [vmem:[#allocation7 + $0x48] sm:$0xff] }
  0x1b   :  { %177 = vmatpush.msra.mxu2 %v174_v20  ;;  %v168_v26 = vld [vmem:[#allocation7 + $0x40] sm:$0xff]  ;;  %v167_v27 = vld [vmem:[#allocation7 + $0x38] sm:$0xff]  ;;  %v166_v28 = vld [vmem:[#allocation7 + $0x30] sm:$0xff] }
  0x1c   :  { %143 = vmatpush.msra.mxu1 %v130_v7  ;;  %v165_v29 = vld [vmem:[#allocation7 + $0x28] sm:$0xff]  ;;  %v164_v30 = vld [vmem:[#allocation7 + $0x20] sm:$0xff]  ;;  %v163_v31 = vld [vmem:[#allocation7 + $0x18] sm:$0xff] }
  0x1d   :  { %178 = vmatpush.msra.mxu2 %v173_v21  ;;  %v218_v32 = vld [vmem:[%s397_s2] ss:$0 sm:$0xff]  ;;  %v162_v36 = vld [vmem:[#allocation7 + $0x10] sm:$0xff]  ;;  %v160_v38 = vld [vmem:[#allocation7] sm:$0xff] }
  0x1e   :  { %144 = vmatpush.msra.mxu1 %v129_v8  ;;  %v161_v37 = vld [vmem:[#allocation7 + $0x8] sm:$0xff] }
  0x1f   :  { %179 = vmatpush.msra.mxu2 %v172_v22  ;;  %v219_v39 = vld [vmem:[%s399_s4] ss:$0 sm:$0xff] }
  0x20   :  { %145 = vmatpush.msra.mxu1 %v128_v9  ;;  %v220_v43 = vld [vmem:[%s401_s6] ss:$0 sm:$0xff] }
  0x21   :  { %180 = vmatpush.msra.mxu2 %v171_v23 }
  0x22   :  { %146 = vmatpush.msra.mxu1 %v127_v10 }
  0x23   :  { %181 = vmatpush.msra.mxu2 %v170_v24 }
  0x24   :  { %147 = vmatpush.msra.mxu1 %v126_v11 }
  0x25   :  { %182 = vmatpush.msra.mxu2 %v169_v25 }
  0x26   :  { %148 = vmatpush.msra.mxu1 %v125_v12 }
  0x27   :  { %183 = vmatpush.msra.mxu2 %v168_v26 }
  0x28   :  { %149 = vmatpush.msra.mxu1 %v124_v13 }
  0x29   :  { %184 = vmatpush.msra.mxu2 %v167_v27 }
  0x2a   :  { %150 = vmatpush.msra.mxu1 %v123_v14 }
  0x2b   :  { %185 = vmatpush.msra.mxu2 %v166_v28 }
  0x2c   :  { %151 = vmatpush.msra.mxu1 %v122_v15 }
  0x2d   :  { %186 = vmatpush.msra.mxu2 %v165_v29 }
  0x2e   :  { %152 = vmatpush.msra.mxu1 %v121_v16 }
  0x2f   :  { %187 = vmatpush.msra.mxu2 %v164_v30 }
  0x30   :  { %153 = vmatpush.msra.mxu1 %v120_v17 }
  0x31   :  { %188 = vmatpush.msra.mxu2 %v163_v31 }
  0x32   :  { %154 = vmatpush.msra.mxu1 %v119_v18 }
  0x33   :  { %189 = vmatpush.msra.mxu2 %v162_v36 }
  0x35   :  { %190 = vmatpush.msra.mxu2 %v161_v37 }
  0x37   :  { %191 = vmatpush.msra.mxu2 %v160_v38 }
  0x93   :  { %v115_v33 = vpop.f32.mrf.mxu0 }
  0x94   :  { %v116_v34 = vadd.f32 %v218_v32, %v115_v33 }
  0x96   :  { %v118_v35 = vmax.f32 %v116_v34, 0.0 }
  0x98   :  { %155 = vmatmul.f32.vlgmr.msra.gmra.mxu1 %v118_v35 }
 0x115   :  { %v156_v40 = vpop.f32.mrf.mxu1 }
 0x116   :  { %v157_v41 = vadd.f32 %v219_v39, %v156_v40 }
 0x118   :  { %v159_v42 = vmax.f32 %v157_v41, 0.0 }
 0x11a   :  { %192 = vmatmul.f32.vlgmr.msra.gmra.mxu2 %v159_v42 }
 0x19d   :  { %v193_v44 = vpop.f32.mrf.mxu2 }
 0x19e   :  { %v200_v45 = vadd.f32 %v220_v43, %v193_v44 }
 0x1a0   :  { %221 = vtanh.f32 %v200_v45 }
 0x1a6   :  { %v222_v46 = vpop.eup %221 }
 0x1a7   :  { %203 = vst.msk [vmem:[%s402_s7] sm:$0xff] %vm202_vm1, %v222_v46 }
 0x1a8   :  { %208 = vsyncpa [#allocation3], 1 }
 0x1a9   :  { %209 = vsyncpa [#allocation5], 1 }
 0x1aa   :  { %210 = vsyncpa [#allocation8], 1 }

</bundles_post_ra>
